<compile_context>
chip_gen: v7x
topology: tpu7x:2x2x1
jax: 0.10.0
libtpu: 0.0.40
codegen_flags: <defaults>
</compile_context>

<pallas_src>
import jax
import jax.numpy as jnp
from jax.experimental import pallas as pl
from jax.experimental.pallas import tpu as pltpu

NEG_SLOPE = 0.2                          # PyG GATv2Conv default negative_slope
LIN_COEF = 0.5 * (1.0 + NEG_SLOPE)       # 0.6  (separable part of leaky_relu)
ABS_COEF = 0.5 * (1.0 - NEG_SLOPE)       # 0.4  (abs part of leaky_relu)
LN_EPS = 1e-5                            # nn.LayerNorm default eps
MASK_BIAS = -1e30                        # additive bias for non-edges
_INV_SQRT2 = 0.7071067811865475
_VMEM_LIMIT = 32 * 1024 * 1024           # safe on v5e/v6e/v7x (64 MiB phys min)


def _pick_tile(dim, base, target):
    """Largest multiple of `base` that divides `dim` and is <= `target`;
    falls back to the full extent (always legal for the (8,128) block rule).
    TODO(synk): pad N to a multiple of 128 instead of the fallback for large
    graphs with awkward N (keeps lane-aligned tiles / pipelining)."""
    if dim <= target:
        return dim
    t = (target // base) * base
    while t >= base:
        if dim % t == 0:
            return t
        t -= base
    return dim


def _attn_row_tile(n):
    """Target-row tile: up to 512 rows, but keep >=2 tiles on the parallel
    i-axis when n allows so v7x's two TensorCores both get work."""
    if n >= 32:
        target = min(512, max(8, (n // 2) // 8 * 8))
    else:
        target = n
    return _pick_tile(n, 8, target)


# ----------------------------------------------------------------------------
# Kernel 1: fused dual projection   [xl | xr] = x @ [Wl | Wr] + [bl | br]
#   Single K block (W resident across the row grid), bf16 MXU operands,
#   f32 accumulation and f32 outputs.
# ----------------------------------------------------------------------------
def _proj_kernel(x_ref, w_ref, b_ref, xl_ref, xr_ref):
    f_out = xl_ref.shape[-1]
    y = jnp.dot(x_ref[...], w_ref[...], preferred_element_type=jnp.float32)
    y = y + b_ref[...]
    xl_ref[...] = y[:, :f_out]
    xr_ref[...] = y[:, f_out:]


def fused_projection(x, w_cat, b_cat, f_out):
    """Returns (x_l, x_r), each [N, f_out] f32 (lane-dense)."""
    n, f_in = x.shape
    tm = _pick_tile(n, 8, 256)
    grid = (n // tm,)
    x16 = x.astype(jnp.bfloat16)          # bf16 MXU operands, halved x/W traffic
    w16 = w_cat.astype(jnp.bfloat16)
    return pl.pallas_call(
        _proj_kernel,
        grid_spec=pltpu.PrefetchScalarGridSpec(
            num_scalar_prefetch=0,
            grid=grid,
            in_specs=[
                pl.BlockSpec((tm, f_in), lambda m: (m, 0)),           # x (bf16)
                pl.BlockSpec((f_in, 2 * f_out), lambda m: (0, 0)),    # [Wl|Wr]
                pl.BlockSpec((1, 2 * f_out), lambda m: (0, 0)),       # [bl|br]
            ],
            out_specs=[
                pl.BlockSpec((tm, f_out), lambda m: (m, 0)),          # x_l
                pl.BlockSpec((tm, f_out), lambda m: (m, 0)),          # x_r
            ],
        ),
        out_shape=(jax.ShapeDtypeStruct((n, f_out), jnp.float32),
                   jax.ShapeDtypeStruct((n, f_out), jnp.float32)),
        compiler_params=pltpu.CompilerParams(
            dimension_semantics=("parallel",),
            vmem_limit_bytes=_VMEM_LIMIT,
        ),
    )(x16, w16, b_cat.reshape(1, -1))


# ----------------------------------------------------------------------------
# Kernel 2: GATv2 attention + aggregation + conv bias + LayerNorm + GELU.
#   grid = (target row tiles [parallel], source col tiles [arbitrary, last]).
#   Online-softmax state (m, l) and the output accumulator are VMEM scratch of
#   shape [TI, F] with per-head values replicated over that head's C lanes;
#   all scratch reads/writes are full-width lane-dense (one per step).
# ----------------------------------------------------------------------------
def _make_attn_kernel(n_heads):
    H = n_heads

    def kernel(att_ref, xl_ref, xlt_ref, xr_ref, adjb_ref,
               b_ref, g_ref, bt_ref, o_ref, m_sc, l_sc, acc_sc):
        TJ, F = xl_ref.shape
        TI = xr_ref.shape[0]
        C = F // H
        j = pl.program_id(1)

        @pl.when(j == 0)
        def _init():
            m_sc[...] = jnp.full_like(m_sc, -jnp.inf)
            l_sc[...] = jnp.zeros_like(l_sc)
            acc_sc[...] = jnp.zeros_like(acc_sc)

        xl = xl_ref[...]                            # [TJ, F] sources (agg RHS)
        xlt = xlt_ref[...]                          # [F, TJ] sources, j on lanes
        xr = xr_ref[...]                            # [TI, F] targets
        adjb = adjb_ref[...].astype(jnp.float32)    # bf16 0/-1e30 -> f32

        m_old = m_sc[...]                           # one full-width load
        m_parts, sum_parts, agg_parts = [], [], []

        for h in range(H):
            c0 = h * C
            # score e[i,j] = sum_c a_c * leaky_relu(xr[i,f] + xl[j,f])
            #             = 0.6*(lin_r[i] + lin_l[j]) + sum_c 0.4*a_c*|xr+xl|
            lin_r = jnp.zeros((TI, 1), jnp.float32)
            lin_l = jnp.zeros((1, TJ), jnp.float32)
            s = adjb
            for c in range(C):
                f = c0 + c
                a = att_ref[f]                      # SMEM scalar
                xr_f = xr[:, f:f + 1]               # [TI, 1]
                xl_f = xlt[f:f + 1, :]              # [1, TJ]
                lin_r = lin_r + xr_f * (LIN_COEF * a)
                lin_l = lin_l + xl_f * (LIN_COEF * a)
                s = s + jnp.abs(xr_f + xl_f) * (ABS_COEF * a)
            s = s + lin_r + lin_l                   # rank-1 separable term

            # online-softmax update for head h (values only; stores batched)
            m_old_h = m_old[:, c0:c0 + 1]                            # [TI, 1]
            m_new_h = jnp.maximum(m_old_h, jnp.max(s, axis=-1, keepdims=True))
            p = jnp.exp(s - m_new_h)                                 # [TI, TJ]
            m_parts.append(jnp.broadcast_to(m_new_h, (TI, C)))
            sum_parts.append(jnp.broadcast_to(
                jnp.sum(p, axis=-1, keepdims=True), (TI, C)))
            # per-head aggregation dot, bf16 MXU operands, f32 accumulation
            agg_parts.append(jnp.dot(p.astype(jnp.bfloat16),
                                     xl[:, c0:c0 + C].astype(jnp.bfloat16),
                                     preferred_element_type=jnp.float32))

        m_new = jnp.concatenate(m_parts, axis=1)                     # [TI, F]
        scale = jnp.exp(m_old - m_new)                               # [TI, F]
        l_sc[...] = scale * l_sc[...] + jnp.concatenate(sum_parts, axis=1)
        acc_sc[...] = scale * acc_sc[...] + jnp.concatenate(agg_parts, axis=1)
        m_sc[...] = m_new

        @pl.when(j == pl.num_programs(1) - 1)
        def _finalize():
            # exact divide: epilogue-only, so precision is free here
            out = acc_sc[...] / l_sc[...] + b_ref[...]               # + conv bias
            # residual=False (module default); a residual add would go here.
            mu = jnp.mean(out, axis=-1, keepdims=True)
            var = jnp.mean(jnp.square(out - mu), axis=-1, keepdims=True)
            xn = (out - mu) * jax.lax.rsqrt(var + LN_EPS)
            y = xn * g_ref[...] + bt_ref[...]
            # exact (erf) GELU == torch.nn.GELU(approximate='none')
            o_ref[...] = 0.5 * y * (1.0 + jax.lax.erf(y * _INV_SQRT2))

    return kernel


def gatv2_attention_layer(x_l, x_r, att_flat, adj_bias_b16,
                          conv_bias, gamma, beta, n_heads):
    n, f = x_l.shape
    ti = _attn_row_tile(n)
    tj = _pick_tile(n, 128, 256)
    grid = (n // ti, n // tj)
    # TODO(synk): fold this transpose into the kernel (XLU slot is idle) once
    # non-128-aligned in-kernel transposes lower robustly; for now XLA builds
    # the [F, N] copy once per layer.
    x_lt = x_l.T
    kernel = _make_attn_kernel(n_heads)
    return pl.pallas_call(
        kernel,
        grid_spec=pltpu.PrefetchScalarGridSpec(
            num_scalar_prefetch=0,
            grid=grid,
            in_specs=[
                pl.BlockSpec(memory_space=pltpu.MemorySpace.SMEM),    # att
                pl.BlockSpec((tj, f), lambda i, j: (j, 0)),           # x_l
                pl.BlockSpec((f, tj), lambda i, j: (0, j)),           # x_l^T
                pl.BlockSpec((ti, f), lambda i, j: (i, 0)),           # x_r
                pl.BlockSpec((ti, tj), lambda i, j: (i, j)),          # adj bias (bf16)
                pl.BlockSpec((1, f), lambda i, j: (0, 0)),            # conv bias
                pl.BlockSpec((1, f), lambda i, j: (0, 0)),            # LN gamma
                pl.BlockSpec((1, f), lambda i, j: (0, 0)),            # LN beta
            ],
            out_specs=pl.BlockSpec((ti, f), lambda i, j: (i, 0)),
            scratch_shapes=[pltpu.VMEM((ti, f), jnp.float32),   # running max m
                            pltpu.VMEM((ti, f), jnp.float32),   # running sum l
                            pltpu.VMEM((ti, f), jnp.float32)],  # accumulator
        ),
        out_shape=jax.ShapeDtypeStruct((n, f), jnp.float32),
        compiler_params=pltpu.CompilerParams(
            dimension_semantics=("parallel", "arbitrary"),
            vmem_limit_bytes=_VMEM_LIMIT,
        ),
    )(att_flat, x_l, x_lt, x_r, adj_bias_b16,
      conv_bias.reshape(1, f), gamma.reshape(1, f), beta.reshape(1, f))


# ----------------------------------------------------------------------------
# Parameter init (deterministic glorot-uniform; shapes follow GATv2.__init__)
# ----------------------------------------------------------------------------
def _glorot(key, shape, fan_in, fan_out):
    limit = (6.0 / (fan_in + fan_out)) ** 0.5
    return jax.random.uniform(key, shape, jnp.float32, -limit, limit)


def init_gatv2_params(key, input_dim, output_dim, hidden_dim,
                      num_gnn_layers, n_heads):
    min_dim = hidden_dim // n_heads
    out_head = output_dim // n_heads
    if num_gnn_layers == 1:
        layer_dims = [(input_dim, out_head)]
    else:
        layer_dims = ([(input_dim, min_dim)]
                      + [(hidden_dim, min_dim)] * (num_gnn_layers - 2)
                      + [(hidden_dim, out_head)])
    params = []
    for fin, c in layer_dims:
        fout = n_heads * c
        key, k1, k2, k3 = jax.random.split(key, 4)
        wl = _glorot(k1, (fin, fout), fin, fout)
        wr = _glorot(k2, (fin, fout), fin, fout)
        params.append(dict(
            W=jnp.concatenate([wl, wr], axis=1),                 # [fin, 2*fout]
            b=jnp.zeros((2 * fout,), jnp.float32),               # [bl | br]
            att=_glorot(k3, (n_heads, c), c, c).reshape(-1),     # flat [H*C]
            bias=jnp.zeros((fout,), jnp.float32),                # conv bias
            gamma=jnp.ones((fout,), jnp.float32),                # LN weight
            beta=jnp.zeros((fout,), jnp.float32),                # LN bias
        ))
    return params


# ----------------------------------------------------------------------------
# Forward pass (mirrors GATv2.forward; residual=False, dropout=0)
# ----------------------------------------------------------------------------
def build_adj_bias(edge_index, num_nodes):
    """Additive attention bias: 0 where edge j->i (incl. self loops), -1e30 else.
    Row = target i, col = source j.  Stored as bf16 (halved HBM stream); the
    magnitude stays >> 1e3 so the online-softmax rescale underflows to 0."""
    src, dst = edge_index[0], edge_index[1]
    bias = jnp.full((num_nodes, num_nodes), MASK_BIAS, jnp.float32)
    bias = bias.at[dst, src].set(0.0)
    idx = jnp.arange(num_nodes)
    bias = bias.at[idx, idx].set(0.0)   # add_self_loops=True
    return bias.astype(jnp.bfloat16)


def gatv2_forward(params, x, edge_index, n_heads, edge_attr=None):
    # TODO(synk): edge_attr / lin_edge path not implemented (edge_dim=None config).
    num_nodes = x.shape[0]
    adj_bias = build_adj_bias(edge_index, num_nodes)
    for p in params:
        f_out = p["W"].shape[1] // 2
        x_l, x_r = fused_projection(x, p["W"], p["b"], f_out)
        x = gatv2_attention_layer(x_l, x_r, p["att"], adj_bias,
                                  p["bias"], p["gamma"], p["beta"], n_heads)
        # residual=False (module default): no skip connection.
    return x


# ----------------------------------------------------------------------------
# Pure-JAX f32 reference (dense-mask GATv2Conv + LayerNorm + exact GELU)
# ----------------------------------------------------------------------------
def gatv2_reference(params, x, edge_index, n_heads):
    n = x.shape[0]
    src, dst = edge_index[0], edge_index[1]
    adj = jnp.zeros((n, n), jnp.float32).at[dst, src].set(1.0)
    adj = jnp.maximum(adj, jnp.eye(n, dtype=jnp.float32))
    for p in params:
        fout = p["W"].shape[1] // 2
        c = fout // n_heads
        y = x @ p["W"] + p["b"]
        xl = y[:, :fout].reshape(n, n_heads, c)
        xr = y[:, fout:].reshape(n, n_heads, c)
        att = p["att"].reshape(n_heads, c)
        pair = xr[:, None] + xl[None, :]                        # [N, N, H, C]
        pair = jnp.where(pair >= 0.0, pair, NEG_SLOPE * pair)
        e = jnp.einsum("ijhc,hc->ijh", pair, att)
        e = jnp.where(adj[:, :, None] > 0.0, e, -jnp.inf)
        alpha = jax.nn.softmax(e, axis=1)
        out = jnp.einsum("ijh,jhc->ihc", alpha, xl).reshape(n, fout) + p["bias"]
        mu = out.mean(-1, keepdims=True)
        var = jnp.square(out - mu).mean(-1, keepdims=True)
        yv = (out - mu) / jnp.sqrt(var + LN_EPS) * p["gamma"] + p["beta"]
        x = 0.5 * yv * (1.0 + jax.lax.erf(yv * _INV_SQRT2))
    return x


# ----------------------------------------------------------------------------
if __name__ == "__main__":
    key = jax.random.PRNGKey(0)
    kx, kp = jax.random.split(key)

    # small config: GATv2(input_dim=16, output_dim=32, hidden_dim=32,
    #                     num_gnn_layers=2, n_heads=4, norm='layer', GELU)
    N = 8
    input_dim, hidden_dim, output_dim = 16, 32, 32
    num_gnn_layers, n_heads = 2, 4

    x = jax.random.normal(kx, (N, input_dim), jnp.float32)

    # deterministic duplicate-free edge list (src row 0, dst row 1)
    src = jnp.array(list(range(N)) * 2, jnp.int32)
    dst = jnp.array([(i + 1) % N for i in range(N)]
                    + [(i + 3) % N for i in range(N)], jnp.int32)
    edge_index = jnp.stack([src, dst])                          # [2, 16]

    params = init_gatv2_params(kp, input_dim, output_dim, hidden_dim,
                               num_gnn_layers, n_heads)

    y = gatv2_forward(params, x, edge_index, n_heads)
    jax.block_until_ready(y)
    assert y.shape == (N, output_dim)

    # Reference is pure f32; the kernel uses bf16 MXU operands (per the perf
    # review) with f32 accumulation, so allow two layers of bf16 rounding.
    y_ref = gatv2_reference(params, x, edge_index, n_heads)
    err = float(jnp.max(jnp.abs(y - y_ref)))
    assert err < 6e-2, f"kernel mismatch vs reference: max abs err {err}"

    print("KERNEL_OK")
</pallas_src>

<mosaic_0001>
module attributes {stable_mosaic.version = 11 : i64} {
  func.func @_proj_kernel(%arg0: i32, %arg1: memref<8x16xbf16, #tpu.memory_space<vmem>>, %arg2: memref<16x64xbf16, #tpu.memory_space<vmem>>, %arg3: memref<1x64xf32, #tpu.memory_space<vmem>>, %arg4: memref<8x32xf32, #tpu.memory_space<vmem>>, %arg5: memref<8x32xf32, #tpu.memory_space<vmem>>) attributes {dimension_semantics = [#tpu.dimension_semantics<parallel>], iteration_bounds = array<i64: 1>, scalar_prefetch = 0 : i64, scratch_operands = 0 : i64, tpu.core_type = #tpu.core_type<tc>, window_params = [{transform_indices = @transform_0, window_bounds = array<i64: 8, 16>}, {pipeline_mode = #tpu.pipeline_mode<synchronous>, transform_indices = @transform_1, window_bounds = array<i64: 16, 64>}, {pipeline_mode = #tpu.pipeline_mode<synchronous>, transform_indices = @transform_2, window_bounds = array<i64: 1, 64>}, {transform_indices = @transform_3, window_bounds = array<i64: 8, 32>}, {transform_indices = @transform_4, window_bounds = array<i64: 8, 32>}]} {
    %c0 = arith.constant 0 : index
    %c0_0 = arith.constant 0 : index
    %0 = vector.load %arg1[%c0, %c0_0] : memref<8x16xbf16, #tpu.memory_space<vmem>>, vector<8x16xbf16>
    %c0_1 = arith.constant 0 : index
    %c0_2 = arith.constant 0 : index
    %1 = vector.load %arg2[%c0_1, %c0_2] : memref<16x64xbf16, #tpu.memory_space<vmem>>, vector<16x64xbf16>
    %cst = arith.constant dense<0.000000e+00> : vector<8x64xf32>
    %2 = tpu.matmul %0, %1, %cst {dimension_numbers = #tpu.dot_dimension_numbers<[1], [0], [0], [1], [0, 0, 1, 1], [], []>} : vector<8x16xbf16>, vector<16x64xbf16>, vector<8x64xf32> -> vector<8x64xf32>
    %c0_3 = arith.constant 0 : index
    %c0_4 = arith.constant 0 : index
    %3 = vector.load %arg3[%c0_3, %c0_4] : memref<1x64xf32, #tpu.memory_space<vmem>>, vector<1x64xf32>
    %4 = vector.broadcast %3 : vector<1x64xf32> to vector<8x64xf32>
    %5 = arith.addf %2, %4 : vector<8x64xf32>
    %6 = vector.extract_strided_slice %5 {offsets = [0, 0], sizes = [8, 32], strides = [1, 1]} : vector<8x64xf32> to vector<8x32xf32>
    %c0_5 = arith.constant 0 : index
    %c0_6 = arith.constant 0 : index
    %7 = vector.load %arg4[%c0_5, %c0_6] : memref<8x32xf32, #tpu.memory_space<vmem>>, vector<8x32xf32>
    tpu.vector_store %arg4[%c0_5, %c0_6], %6 {strides = array<i32>} : memref<8x32xf32, #tpu.memory_space<vmem>>, vector<8x32xf32>,
    %8 = vector.extract_strided_slice %5 {offsets = [0, 32], sizes = [8, 32], strides = [1, 1]} : vector<8x64xf32> to vector<8x32xf32>
    %c0_7 = arith.constant 0 : index
    %c0_8 = arith.constant 0 : index
    %9 = vector.load %arg5[%c0_7, %c0_8] : memref<8x32xf32, #tpu.memory_space<vmem>>, vector<8x32xf32>
    tpu.vector_store %arg5[%c0_7, %c0_8], %8 {strides = array<i32>} : memref<8x32xf32, #tpu.memory_space<vmem>>, vector<8x32xf32>,
    return
  }
  func.func @transform_0(%arg0: i32) -> (i32, i32) {
    %c0_i32 = arith.constant 0 : i32
    %c0_i32_0 = arith.constant 0 : i32
    return %arg0, %c0_i32 : i32, i32
  }
  func.func @transform_1(%arg0: i32) -> (i32, i32) {
    %c0_i32 = arith.constant 0 : i32
    %c0_i32_0 = arith.constant 0 : i32
    %c0_i32_1 = arith.constant 0 : i32
    return %c0_i32, %c0_i32_0 : i32, i32
  }
  func.func @transform_2(%arg0: i32) -> (i32, i32) {
    %c0_i32 = arith.constant 0 : i32
    %c0_i32_0 = arith.constant 0 : i32
    %c0_i32_1 = arith.constant 0 : i32
    return %c0_i32, %c0_i32_0 : i32, i32
  }
  func.func @transform_3(%arg0: i32) -> (i32, i32) {
    %c0_i32 = arith.constant 0 : i32
    %c0_i32_0 = arith.constant 0 : i32
    return %arg0, %c0_i32 : i32, i32
  }
  func.func @transform_4(%arg0: i32) -> (i32, i32) {
    %c0_i32 = arith.constant 0 : i32
    %c0_i32_0 = arith.constant 0 : i32
    return %arg0, %c0_i32 : i32, i32
  }
}

</mosaic_0001>

<bundles_post_ra>
// kernel: tpu_custom_call.1
= control target key start
LH: loop header
LB: loop body
LE: loop exit
PB: predicated region body
PF: predicated region fallthrough
CT: control target
= control target key end

     0   :  { %10 = vsyncpa [#allocation3], 0  ;;  %s353_s0 = inlined_call_operand.hbm [shape: bf16[8,16], index: 0, kind: input, shape index: {}]   ;;  %s354_s1 = inlined_call_operand.hbm [shape: bf16[16,64], index: 1, kind: input, shape index: {}]   ;;  %s355_s2 = inlined_call_operand.vmem [shape: f32[1,64], index: 2, kind: input, shape index: {}]   ;;  %s356_s3 = inlined_call_operand.hbm [shape: f32[8,32], index: 3, kind: output, shape index: {0}]   ;;  %s357_s4 = inlined_call_operand.hbm [shape: f32[8,32], index: 4, kind: output, shape index: {1}]  }
   0x1   :  { %11 = vsyncpa [#allocation6], 0 }
   0x2   :  { %12 = vsyncpa [#allocation4], 0 }
   0x3   :  { %13 = vsyncpa [#allocation9], 0  ;;  %s259_s15 = smov [#allocation2]   ;;  %s260_s17 = smov [#allocation5]  }
   0x4   :  { %s20_s16 = sshll.u32 %s259_s15, 4  ;;  %s29_s18 = sshll.u32 %s260_s17, 4  ;;  %s21_s16 = int_to_ptr.vmem [resolvable:$true] %s20_s16  ;;  %s293_s18 = int_to_ptr.vmem [resolvable:$true] %s29_s18 }
   0x5   :  { %s163_s21 = scalar_lea.hbm %s353_s0, 64 }
   0x6   :  { %p164_p0 = scmp.ne.s32.totalorder %s353_s0, %s163_s21  ;;  %p167_p1 = scmp.lt.u32.totalorder %s163_s21, %s353_s0 }
   0x8   :  { %p169_p2 = pnand %p167_p1, %p164_p0 }
   0xa   :  { %172 = shalt.err (!%p169_p2)
}
   0xb   :  { %s173_s26 = scalar_lea.vmem %s21_s16, 64  ;;  %p178_p4 = scmp.lt.s32.totalorder %s21_s16, %s21_s16 }
   0xc   :  { %p174_p3 = scmp.ne.s32.totalorder %s21_s16, %s173_s26  ;;  %p179_p5 = scmp.lt.s32.totalorder %s173_s26, %s173_s26 }
   0xe   :  { %p180_p6 = por %p179_p5, %p178_p4 }
  0x10   :  { %p181_p7 = pnand %p180_p6, %p174_p3 }
  0x12   :  { %184 = shalt.err (!%p181_p7)
}
  0x13   :  { %23 = dma.hbm_to_vmem [thread:$0]  %s353_s0, 64, %s21_s16, [#allocation3]  }
  0x14   :  { %s185_s5 = scalar_lea.hbm %s354_s1, 128 }
  0x15   :  { %p186_p8 = scmp.ne.s32.totalorder %s354_s1, %s185_s5  ;;  %p189_p9 = scmp.lt.u32.totalorder %s185_s5, %s354_s1 }
  0x17   :  { %p191_p10 = pnand %p189_p9, %p186_p8 }
  0x19   :  { %194 = shalt.err (!%p191_p10)
}
  0x1a   :  { %s195_s10 = scalar_lea.vmem %s293_s18, 128  ;;  %p200_p12 = scmp.lt.s32.totalorder %s293_s18, %s293_s18 }
  0x1b   :  { %p196_p11 = scmp.ne.s32.totalorder %s293_s18, %s195_s10  ;;  %p201_p13 = scmp.lt.s32.totalorder %s195_s10, %s195_s10 }
  0x1d   :  { %p202_p0 = por %p201_p13, %p200_p12 }
  0x1f   :  { %p203_p1 = pnand %p202_p0, %p196_p11 }
  0x21   :  { %206 = shalt.err (!%p203_p1)
}
  0x22   :  { %s261_s0 = smov 64   ;;  %s262_s11 = smov 4  }
  0x23   :  { %35 = dma.hbm_to_vmem [thread:$0]  %s354_s1, 128, %s293_s18, [#allocation6], %s261_s0, %s261_s0, %s262_s11  }
  0x24   :  { %251 = dma.done.wait [#allocation3], 64  }
  0x25   :  { %252 = vsyncadd [#allocation3], 4294967232 }
  0x26   :  { %253 = dma.done.wait [#allocation6], 128  }
  0x27   :  { %254 = vsyncadd [#allocation6], 4294967168  ;;  %v263_v0 = vmov 0.0   ;;  %vm264_vm0 = vmmov 0   ;;  %v162_v1 = vld [vmem:[#allocation5] sm:$0xff]   ;;  %vm61_vm1 = vcmask 130048  }
  0x28   :  { %147 = vmatprep.subr.bf16.mxu0 %v263_v0  ;;  %149 = vmatprep.mubr.msk.bf16.mxu0 %vm264_vm0, %v263_v0  ;;  %v45_v2 = vld [vmem:[#allocation2] sm:$0xf]  ;;  %s265_s16 = smov [#allocation7]   ;;  %vm105_vm2 = vcmask 261120   ;;  %s266_s1 = smov 96  }
  0x29   :  { %148 = vmatpush3.bf16.msra.mxu0 %v162_v1  ;;  %v142_v3 = vld [vmem:[%s355_s2] ss:$0 sm:$0xff]  ;;  %s118_s17 = sshll.u32 %s265_s16, 4  ;;  %s119_s17 = int_to_ptr.vmem [resolvable:$true] %s118_s17 }
  0x2a   :  { %s207_s18 = scalar_lea.vmem %s119_s17, 128  ;;  %p212_p3 = scmp.lt.s32.totalorder %s119_s17, %s119_s17 }
  0x2b   :  { %p208_p2 = scmp.ne.s32.totalorder %s119_s17, %s207_s18  ;;  %p213_p4 = scmp.lt.s32.totalorder %s207_s18, %s207_s18 }
  0x2c   :  { %150 = vmatmul.mubr.msk.bf16.vlgmr.msra.gmra.mrb[0].mxu0 %vm61_vm1, %v45_v2 }
  0x2d   :  { %p214_p5 = por %p213_p4, %p212_p3 }
  0x2f   :  { %p215_p6 = pnand %p214_p5, %p208_p2 }
  0xff   :  { %v99_v4 = vpop.f32.mrb[0].mxu0 }
 0x100   :  { %v100_v5 = vadd.f32 %v142_v3, %v99_v4  ;;  %v151_v6 = vpop.f32.mrb[1].mxu0 }
 0x101   :  { %v102_v7 = vpop.f32.mrb[2].mxu0 }
 0x102   :  { %v152_v8 = vpop.f32.mrb[3].mxu0  ;;  %108 = vrot.lane.b32.xlu0 %v100_v5, %s266_s1  ;;  %106 = vst.msk [vmem:[#allocation7] sm:$0xff] %vm105_vm2, %v100_v5 }
 0x103   :  { %218 = shalt.err (!%p215_p6)
}
 0x104   :  { %s219_s20 = scalar_lea.hbm %s356_s3, 128 }
 0x105   :  { %p220_p7 = scmp.ne.s32.totalorder %s356_s3, %s219_s20  ;;  %p223_p8 = scmp.lt.u32.totalorder %s219_s20, %s356_s3 }
 0x107   :  { %p225_p9 = pnand %p223_p8, %p220_p7 }
 0x109   :  { %228 = shalt.err (!%p225_p9)
}
 0x10a   :  { %121 = dma.vmem_to_hbm [thread:$0]  %s119_s17, 128, %s356_s3, [#allocation4]  }
 0x10b   :  { %s267_s27 = smov [#allocation8]  }
 0x10c   :  { %s128_s28 = sshll.u32 %s267_s27, 4  ;;  %s129_s28 = int_to_ptr.vmem [resolvable:$true] %s128_s28 }
 0x10d   :  { %s229_s29 = scalar_lea.vmem %s129_s28, 128  ;;  %p234_p11 = scmp.lt.s32.totalorder %s129_s28, %s129_s28 }
 0x10e   :  { %p230_p10 = scmp.ne.s32.totalorder %s129_s28, %s229_s29  ;;  %p235_p12 = scmp.lt.s32.totalorder %s229_s29, %s229_s29 }
 0x110   :  { %p236_p13 = por %p235_p12, %p234_p11 }
 0x112   :  { %p237_p0 = pnand %p236_p13, %p230_p10 }
 0x174   :  { %v109_v9 = vpop.permute.xlu0 %108 }
 0x175   :  { %111 = vst.msk [vmem:[#allocation8] sm:$0xff] %vm105_vm2, %v109_v9 }
 0x176   :  { %240 = shalt.err (!%p237_p0)
}
 0x177   :  { %s241_s6 = scalar_lea.hbm %s357_s4, 128 }
 0x178   :  { %p242_p1 = scmp.ne.s32.totalorder %s357_s4, %s241_s6  ;;  %p245_p2 = scmp.lt.u32.totalorder %s241_s6, %s357_s4 }
 0x17a   :  { %p247_p3 = pnand %p245_p2, %p242_p1 }
 0x17c   :  { %250 = shalt.err (!%p247_p3)
}
 0x17d   :  { %131 = dma.vmem_to_hbm [thread:$0]  %s129_s28, 128, %s357_s4, [#allocation9]  }
 0x17e   :  { %255 = dma.done.wait [#allocation4], 128  }
 0x17f   :  { %256 = vsyncadd [#allocation4], 4294967168 }
 0x180   :  { %257 = dma.done.wait [#allocation9], 128  }
 0x181   :  { %258 = vsyncadd [#allocation9], 4294967168 }
 0x182   :  { %138 = vsyncpa [#allocation3], 1 }
 0x183   :  { %139 = vsyncpa [#allocation6], 1 }
 0x184   :  { %140 = vsyncpa [#allocation4], 1 }
 0x185   :  { %141 = vsyncpa [#allocation9], 1 }

</bundles_post_ra>
